<compile_context>
chip_gen: v7x
topology: tpu7x:2x2x1
jax: 0.10.0
libtpu: 0.0.40
codegen_flags: <defaults>
</compile_context>

<pallas_src>
import functools

import jax
import jax.numpy as jnp
from jax.experimental import pallas as pl
from jax.experimental.pallas import tpu as pltpu


LANES = 128          # batch elements sit on the TPU lane axis
SUBLANES = 8         # f32 sublane granularity
MAX_TILE_ROWS = 2048 # 2048*128*4B = 1 MiB per buffer


def _round_up(x, m):
    return ((x + m - 1) // m) * m


# -----------------------------------------------------------------------------
# Kernel: elementwise on lane-dense [tile_rows, 128] f32 tiles.
#   out = sigmoid(C * sigmoid(disc) * (theta - diff)),  C = ratio * a_range
# (theta/diff arrive already sigmoid-transformed when the module flag is set.)
# -----------------------------------------------------------------------------
def _irt_kernel(theta_ref, disc_ref, diff_ref, out_ref, *, c):
    theta = theta_ref[...]
    disc = disc_ref[...]
    diff = diff_ref[...]
    out_ref[...] = jax.nn.sigmoid(c * jax.nn.sigmoid(disc) * (theta - diff))


def irt_forward(stu_id, exer_id, params, *, ratio=1.703, a_range=1.0,
                sigmoid=False):
    """Matches IRT.forward: returns (output [B], b [B,1], theta [B,1])."""
    stu_w = params["student_emb"]   # [student_n, 1]
    disc_w = params["proj_disc"]    # [exer_n, 1]
    diff_w = params["proj_diff"]    # [exer_n, 1]

    # Embedding gather (1 scalar per element) stays in XLA and fuses with the
    # optional sigmoid + pad/reshape below.
    theta = stu_w[stu_id, 0].astype(jnp.float32)    # [B]
    disc = disc_w[exer_id, 0].astype(jnp.float32)   # [B]
    diff = diff_w[exer_id, 0].astype(jnp.float32)   # [B]

    if sigmoid:  # static Python flag, resolved at trace time
        theta = jax.nn.sigmoid(theta)
        diff = jax.nn.sigmoid(diff)

    B = theta.shape[0]

    # Lane-dense packing with fine-grained padding:
    #   rows     = round_up(ceil(B/128), 8)
    #   n_tiles  = ceil(rows / MAX_TILE_ROWS), forced >= 2 when possible (v7x)
    #   tile_rows= round_up(ceil(rows / n_tiles), 8)
    rows = _round_up(pl.cdiv(B, LANES), SUBLANES)
    n_tiles = pl.cdiv(rows, MAX_TILE_ROWS)
    if rows >= 2 * SUBLANES:
        n_tiles = max(n_tiles, 2)   # let both v7x TensorCores stream
    tile_rows = _round_up(pl.cdiv(rows, n_tiles), SUBLANES)
    rows_pad = n_tiles * tile_rows
    B_pad = rows_pad * LANES

    def pack(v):
        return jnp.pad(v, (0, B_pad - B)).reshape(rows_pad, LANES)

    theta_p, disc_p, diff_p = pack(theta), pack(disc), pack(diff)

    kernel = functools.partial(_irt_kernel, c=float(ratio) * float(a_range))
    blk = pl.BlockSpec((tile_rows, LANES), lambda i: (i, 0))

    out_p = pl.pallas_call(
        kernel,
        out_shape=jax.ShapeDtypeStruct((rows_pad, LANES), jnp.float32),
        grid=(n_tiles,),
        in_specs=[blk, blk, blk],
        out_specs=blk,
        compiler_params=pltpu.CompilerParams(
            dimension_semantics=("parallel",)),
    )(theta_p, disc_p, diff_p)

    out = out_p.reshape(-1)[:B]        # output.squeeze() -> [B]
    b = diff[:, None]                  # [B, 1] (post-sigmoid if flag set)
    th = theta[:, None]                # [B, 1] (post-sigmoid if flag set)
    return out, b, th


# -----------------------------------------------------------------------------
# Deterministic parameter init (mimics nn.init.xavier_normal_ on each weight).
# -----------------------------------------------------------------------------
def init_irt_params(key, student_n, exer_n):
    def xavier_normal(k, shape):
        fan_out, fan_in = shape  # PyTorch 2-D convention: (rows, cols)
        std = (2.0 / (fan_in + fan_out)) ** 0.5
        return std * jax.random.normal(k, shape, dtype=jnp.float32)

    k1, k2, k3 = jax.random.split(key, 3)
    return {
        "student_emb": xavier_normal(k1, (student_n, 1)),
        "proj_disc": xavier_normal(k2, (exer_n, 1)),
        "proj_diff": xavier_normal(k3, (exer_n, 1)),
    }


# -----------------------------------------------------------------------------
# Pure-JAX reference (mirrors the PyTorch forward exactly).
# -----------------------------------------------------------------------------
def irt_reference(stu_id, exer_id, params, *, ratio=1.703, a_range=1.0,
                  sigmoid=False):
    theta = params["student_emb"][stu_id]                       # [B, 1]
    a = jax.nn.sigmoid(params["proj_disc"][exer_id]) * a_range  # [B, 1]
    b = params["proj_diff"][exer_id]                            # [B, 1]
    if sigmoid:
        theta = jax.nn.sigmoid(theta)
        b = jax.nn.sigmoid(b)
    out = 1.0 / (1.0 + jnp.exp(-ratio * a * (theta - b)))
    return out.squeeze(-1), b, theta


def _check(batch, student_n, exer_n, *, sigmoid, seed, ratio=1.703, a_range=1.0):
    key = jax.random.PRNGKey(seed)
    kp, ks, ke = jax.random.split(key, 3)
    params = init_irt_params(kp, student_n, exer_n)
    stu_id = jax.random.randint(ks, (batch,), 0, student_n, dtype=jnp.int32)
    exer_id = jax.random.randint(ke, (batch,), 0, exer_n, dtype=jnp.int32)

    out, b, theta = irt_forward(stu_id, exer_id, params,
                                ratio=ratio, a_range=a_range, sigmoid=sigmoid)
    jax.block_until_ready((out, b, theta))

    ref_out, ref_b, ref_theta = irt_reference(
        stu_id, exer_id, params, ratio=ratio, a_range=a_range, sigmoid=sigmoid)
    assert out.shape == (batch,), "output shape mismatch"
    assert b.shape == (batch, 1) and theta.shape == (batch, 1), "aux shape mismatch"
    assert jnp.allclose(out, ref_out, atol=1e-5), "output mismatch"
    assert jnp.allclose(b, ref_b, atol=1e-5), "b mismatch"
    assert jnp.allclose(theta, ref_theta, atol=1e-5), "theta mismatch"


if __name__ == "__main__":
    # Small primary case (single tile, sigmoid=False).
    _check(batch=8, student_n=32, exer_n=64, sigmoid=False, seed=0)
    # Multi-tile / padded / v7x-split path with sigmoid=True.
    _check(batch=2500, student_n=32, exer_n=64, sigmoid=True, seed=0)
    print("KERNEL_OK")
</pallas_src>

<mosaic_0001>
module attributes {stable_mosaic.version = 11 : i64} {
  func.func @_irt_kernel(%arg0: i32, %arg1: memref<8x128xf32, #tpu.memory_space<vmem>>, %arg2: memref<8x128xf32, #tpu.memory_space<vmem>>, %arg3: memref<8x128xf32, #tpu.memory_space<vmem>>, %arg4: memref<8x128xf32, #tpu.memory_space<vmem>>) attributes {dimension_semantics = [#tpu.dimension_semantics<parallel>], iteration_bounds = array<i64: 1>, scalar_prefetch = 0 : i64, scratch_operands = 0 : i64, tpu.core_type = #tpu.core_type<tc>, window_params = [{transform_indices = @transform_0, window_bounds = array<i64: 8, 128>}, {transform_indices = @transform_1, window_bounds = array<i64: 8, 128>}, {transform_indices = @transform_2, window_bounds = array<i64: 8, 128>}, {transform_indices = @transform_3, window_bounds = array<i64: 8, 128>}]} {
    %c0 = arith.constant 0 : index
    %c0_0 = arith.constant 0 : index
    %0 = vector.load %arg1[%c0, %c0_0] : memref<8x128xf32, #tpu.memory_space<vmem>>, vector<8x128xf32>
    %c0_1 = arith.constant 0 : index
    %c0_2 = arith.constant 0 : index
    %1 = vector.load %arg2[%c0_1, %c0_2] : memref<8x128xf32, #tpu.memory_space<vmem>>, vector<8x128xf32>
    %c0_3 = arith.constant 0 : index
    %c0_4 = arith.constant 0 : index
    %2 = vector.load %arg3[%c0_3, %c0_4] : memref<8x128xf32, #tpu.memory_space<vmem>>, vector<8x128xf32>
    %3 = arith.negf %1 : vector<8x128xf32>
    %4 = math.exp %3 : vector<8x128xf32>
    %cst = arith.constant 1.000000e+00 : f32
    %5 = vector.broadcast %cst : f32 to vector<8x128xf32>
    %6 = arith.addf %5, %4 : vector<8x128xf32>
    %7 = arith.divf %5, %6 : vector<8x128xf32>
    %cst_5 = arith.constant 1.703000e+00 : f32
    %8 = vector.broadcast %cst_5 : f32 to vector<8x128xf32>
    %9 = arith.mulf %8, %7 : vector<8x128xf32>
    %10 = arith.subf %0, %2 : vector<8x128xf32>
    %11 = arith.mulf %9, %10 : vector<8x128xf32>
    %12 = arith.negf %11 : vector<8x128xf32>
    %13 = math.exp %12 : vector<8x128xf32>
    %cst_6 = arith.constant 1.000000e+00 : f32
    %14 = vector.broadcast %cst_6 : f32 to vector<8x128xf32>
    %15 = arith.addf %14, %13 : vector<8x128xf32>
    %16 = arith.divf %14, %15 : vector<8x128xf32>
    %c0_7 = arith.constant 0 : index
    %c0_8 = arith.constant 0 : index
    %17 = vector.load %arg4[%c0_7, %c0_8] : memref<8x128xf32, #tpu.memory_space<vmem>>, vector<8x128xf32>
    tpu.vector_store %arg4[%c0_7, %c0_8], %16 {strides = array<i32>} : memref<8x128xf32, #tpu.memory_space<vmem>>, vector<8x128xf32>,
    return
  }
  func.func @transform_0(%arg0: i32) -> (i32, i32) {
    %c0_i32 = arith.constant 0 : i32
    %c0_i32_0 = arith.constant 0 : i32
    return %arg0, %c0_i32 : i32, i32
  }
  func.func @transform_1(%arg0: i32) -> (i32, i32) {
    %c0_i32 = arith.constant 0 : i32
    %c0_i32_0 = arith.constant 0 : i32
    return %arg0, %c0_i32 : i32, i32
  }
  func.func @transform_2(%arg0: i32) -> (i32, i32) {
    %c0_i32 = arith.constant 0 : i32
    %c0_i32_0 = arith.constant 0 : i32
    return %arg0, %c0_i32 : i32, i32
  }
  func.func @transform_3(%arg0: i32) -> (i32, i32) {
    %c0_i32 = arith.constant 0 : i32
    %c0_i32_0 = arith.constant 0 : i32
    return %arg0, %c0_i32 : i32, i32
  }
}

</mosaic_0001>

<bundles_post_ra>
// kernel: tpu_custom_call.1
= control target key start
LH: loop header
LB: loop body
LE: loop exit
PB: predicated region body
PF: predicated region fallthrough
CT: control target
= control target key end

     0   :  { %8 = vsyncpa [#allocation3], 0  ;;  %s265_s0 = inlined_call_operand.hbm [shape: f32[8,128], index: 0, kind: input, shape index: {}]   ;;  %s266_s1 = inlined_call_operand.hbm [shape: f32[8,128], index: 1, kind: input, shape index: {}]   ;;  %s267_s2 = inlined_call_operand.hbm [shape: f32[8,128], index: 2, kind: input, shape index: {}]   ;;  %s268_s3 = inlined_call_operand.hbm [shape: f32[8,128], index: 3, kind: output, shape index: {}]  }
   0x1   :  { %9 = vsyncpa [#allocation6], 0 }
   0x2   :  { %10 = vsyncpa [#allocation4], 0  ;;  %s193_s12 = smov [#allocation5]   ;;  %s194_s14 = smov [#allocation2]  }
   0x3   :  { %s27_s13 = sshll.u32 %s193_s12, 4  ;;  %s17_s15 = sshll.u32 %s194_s14, 4  ;;  %s28_s13 = int_to_ptr.vmem [resolvable:$true] %s27_s13  ;;  %s18_s15 = int_to_ptr.vmem [resolvable:$true] %s17_s15 }
   0x4   :  { %s99_s18 = scalar_lea.hbm %s266_s1, 128 }
   0x5   :  { %p100_p0 = scmp.ne.s32.totalorder %s266_s1, %s99_s18  ;;  %p103_p1 = scmp.lt.u32.totalorder %s99_s18, %s266_s1 }
   0x7   :  { %p105_p2 = pnand %p103_p1, %p100_p0 }
   0x9   :  { %108 = shalt.err (!%p105_p2)
}
   0xa   :  { %s109_s23 = scalar_lea.vmem %s28_s13, 128  ;;  %p114_p4 = scmp.lt.s32.totalorder %s28_s13, %s28_s13 }
   0xb   :  { %p110_p3 = scmp.ne.s32.totalorder %s28_s13, %s109_s23  ;;  %p115_p5 = scmp.lt.s32.totalorder %s109_s23, %s109_s23 }
   0xd   :  { %p116_p6 = por %p115_p5, %p114_p4 }
   0xf   :  { %p117_p7 = pnand %p116_p6, %p110_p3 }
  0x11   :  { %120 = shalt.err (!%p117_p7)
}
  0x12   :  { %30 = dma.hbm_to_vmem [thread:$0]  %s266_s1, 128, %s28_s13, [#allocation6]  }
  0x13   :  { %s121_s28 = scalar_lea.hbm %s265_s0, 128 }
  0x14   :  { %p122_p8 = scmp.ne.s32.totalorder %s265_s0, %s121_s28  ;;  %p125_p9 = scmp.lt.u32.totalorder %s121_s28, %s265_s0 }
  0x16   :  { %p127_p10 = pnand %p125_p9, %p122_p8 }
  0x18   :  { %130 = shalt.err (!%p127_p10)
}
  0x19   :  { %s131_s6 = scalar_lea.vmem %s18_s15, 128  ;;  %p136_p12 = scmp.lt.s32.totalorder %s18_s15, %s18_s15 }
  0x1a   :  { %p132_p11 = scmp.ne.s32.totalorder %s18_s15, %s131_s6  ;;  %p137_p13 = scmp.lt.s32.totalorder %s131_s6, %s131_s6 }
  0x1c   :  { %p138_p0 = por %p137_p13, %p136_p12 }
  0x1e   :  { %p139_p1 = pnand %p138_p0, %p132_p11 }
  0x20   :  { %142 = shalt.err (!%p139_p1)
}
  0x21   :  { %20 = dma.hbm_to_vmem [thread:$0]  %s265_s0, 128, %s18_s15, [#allocation3]  }
  0x22   :  { %s195_s8 = smov [#allocation7]   ;;  %s143_s12 = scalar_lea.hbm %s267_s2, 128 }
  0x23   :  { %s37_s9 = sshll.u32 %s195_s8, 4  ;;  %p144_p2 = scmp.ne.s32.totalorder %s267_s2, %s143_s12  ;;  %s38_s9 = int_to_ptr.vmem [resolvable:$true] %s37_s9 }
  0x24   :  { %p147_p3 = scmp.lt.u32.totalorder %s143_s12, %s267_s2 }
  0x26   :  { %p149_p4 = pnand %p147_p3, %p144_p2 }
  0x28   :  { %152 = shalt.err (!%p149_p4)
}
  0x29   :  { %s153_s18 = scalar_lea.vmem %s38_s9, 128  ;;  %p158_p6 = scmp.lt.s32.totalorder %s38_s9, %s38_s9 }
  0x2a   :  { %p154_p5 = scmp.ne.s32.totalorder %s38_s9, %s153_s18  ;;  %p159_p7 = scmp.lt.s32.totalorder %s153_s18, %s153_s18 }
  0x2c   :  { %p160_p8 = por %p159_p7, %p158_p6 }
  0x2e   :  { %p161_p9 = pnand %p160_p8, %p154_p5 }
  0x30   :  { %164 = shalt.err (!%p161_p9)
}
  0x31   :  { %40 = dma.hbm_to_vmem [thread:$0]  %s267_s2, 128, %s38_s9, [#allocation6]  }
  0x32   :  { %187 = dma.done.wait [#allocation3], 128  }
  0x33   :  { %188 = vsyncadd [#allocation3], 4294967168 }
  0x34   :  { %189 = dma.done.wait [#allocation6], 256  }
  0x35   :  { %190 = vsyncadd [#allocation6], 4294967040  ;;  %v51_v0 = vld [vmem:[#allocation5] sm:$0xff]  ;;  %v50_v4 = vld [vmem:[#allocation2] sm:$0xff]  ;;  %s196_s2 = smov [#allocation8]  }
  0x36   :  { %v85_v1 = vmul.f32 -1.442695, %v51_v0  ;;  %v52_v5 = vld [vmem:[#allocation7] sm:$0xff]  ;;  %s75_s19 = sshll.u32 %s196_s2, 4  ;;  %s76_s19 = int_to_ptr.vmem [resolvable:$true] %s75_s19 }
  0x37   :  { %v60_v6 = vsub.f32 %v50_v4, %v52_v5  ;;  %s165_s20 = scalar_lea.vmem %s76_s19, 128  ;;  %p170_p11 = scmp.lt.s32.totalorder %s76_s19, %s76_s19 }
  0x38   :  { %91 = vpow2.f32 %v85_v1  ;;  %p166_p10 = scmp.ne.s32.totalorder %s76_s19, %s165_s20  ;;  %p171_p12 = scmp.lt.s32.totalorder %s165_s20, %s165_s20 }
  0x3a   :  { %p172_p13 = por %p171_p12, %p170_p11 }
  0x3c   :  { %p173_p0 = pnand %p172_p13, %p166_p10 }
  0x42   :  { %v92_v2 = vpop.eup %91 }
  0x43   :  { %v56_v3 = vadd.f32 1.0, %v92_v2 }
  0x45   :  { %93 = vrcp.f32 %v56_v3 }
  0x4f   :  { %v94_v7 = vpop.eup %93 }
  0x50   :  { %v59_v8 = vmul.f32 1.703, %v94_v7 }
  0x52   :  { %v61_v9 = vmul.f32 %v60_v6, %v59_v8 }
  0x54   :  { %v86_v10 = vmul.f32 -1.442695, %v61_v9 }
  0x56   :  { %95 = vpow2.f32 %v86_v10 }
  0x60   :  { %v96_v11 = vpop.eup %95 }
  0x61   :  { %v65_v12 = vadd.f32 1.0, %v96_v11 }
  0x63   :  { %97 = vrcp.f32 %v65_v12 }
  0x6d   :  { %v98_v13 = vpop.eup %97 }
  0x6e   :  { %68 = vst [vmem:[#allocation8] sm:$0xff] %v98_v13 }
  0x6f   :  { %176 = shalt.err (!%p173_p0)
}
  0x70   :  { %s177_s23 = scalar_lea.hbm %s268_s3, 128 }
  0x71   :  { %p178_p1 = scmp.ne.s32.totalorder %s268_s3, %s177_s23  ;;  %p181_p2 = scmp.lt.u32.totalorder %s177_s23, %s268_s3 }
  0x73   :  { %p183_p3 = pnand %p181_p2, %p178_p1 }
  0x75   :  { %186 = shalt.err (!%p183_p3)
}
  0x76   :  { %78 = dma.vmem_to_hbm [thread:$0]  %s76_s19, 128, %s268_s3, [#allocation4]  }
  0x77   :  { %191 = dma.done.wait [#allocation4], 128  }
  0x78   :  { %192 = vsyncadd [#allocation4], 4294967168 }
  0x79   :  { %82 = vsyncpa [#allocation3], 1 }
  0x7a   :  { %83 = vsyncpa [#allocation6], 1 }
  0x7b   :  { %84 = vsyncpa [#allocation4], 1 }

</bundles_post_ra>
